<compile_context>
chip_gen: v7x
topology: tpu7x:2x2x1
jax: 0.10.0
libtpu: 0.0.40
codegen_flags: <defaults>
</compile_context>

<pallas_src>
import math
from functools import partial

import numpy as np
import jax
import jax.numpy as jnp
from jax.experimental import pallas as pl
from jax.experimental.pallas import tpu as pltpu


# ----------------------------------------------------------------------------
# Kernel
# ----------------------------------------------------------------------------
def _nn_upsample_kernel(x_ref, r_ref, o_ref, *, s):
    """Nearest-neighbor s-times upsample of one (tbc, th, W) tile.

    x_ref : [tbc, th, W]          input tile (W rides the 128-lane axis)
    r_ref : [wc, s*wc]            0/1 replication matrix, R[w, j] = (j // s == w)
    o_ref : [tbc, th, s*s*W]      flat output tile; lane position k*s*W + j holds
                                  output pixel (row_replica=k, col=j), so the
                                  wrapper's reshape to (.., s*th_rows, s*W) is free.
    """
    x = x_ref[...]
    tbc, th, W = x.shape
    wc = r_ref.shape[0]
    sW = s * W
    rows = tbc * th

    # Collapse leading dims (minor dim untouched -> layout-preserving reshape).
    x2 = x.reshape(rows, W).astype(jnp.float32)

    nfull, rem = divmod(W, wc)
    nchunks = nfull + (1 if rem else 0)
    r_full = r_ref[...]  # hoisted; fetched once (constant index_map -> resident)

    for c in range(nchunks):
        cur = wc if c < nfull else rem
        xc = x2[:, c * wc: c * wc + cur]
        rc = r_full if cur == wc else r_ref[:cur, : s * cur]
        # Exact lane replication on the MXU: yc[r, j] = xc[r, j // s].
        yc = jnp.dot(xc, rc, preferred_element_type=jnp.float32)
        yc = yc.reshape(tbc, th, s * cur).astype(o_ref.dtype)
        base = s * c * wc
        # Sublane (H) replication: the same row block goes into each of the s
        # replica slots of the flat minor dim (full-lane-width contiguous stores).
        for k in range(s):
            o_ref[:, :, k * sW + base: k * sW + base + s * cur] = yc


# ----------------------------------------------------------------------------
# Tiling helpers
# ----------------------------------------------------------------------------
def _largest_divisor_leq(n, cap):
    cap = max(1, min(n, int(cap)))
    for d in range(cap, 0, -1):
        if n % d == 0:
            return d
    return 1


def _row_tile(h, cap):
    """Largest divisor of h that is a multiple of 8 and <= cap; fallback: h."""
    cap = max(1, min(h, int(cap)))
    for d in range(cap, 0, -1):
        if h % d == 0 and d % 8 == 0:
            return d
    return h  # full dim is exempt from the /8 rule (may exceed the soft budget)


def _pick_tiles(bc, h, w, itemsize, s):
    # Budget for ONE input tile so that 2 * (input + s^2 output) buffers stay
    # within ~10 MiB (comfortable inside v7x's 32 MiB default scoped VMEM).
    budget = max(64 * 1024, (10 * 1024 * 1024) // (2 * (1 + s * s)))
    slice_bytes = h * w * itemsize
    if slice_bytes <= budget:
        return _largest_divisor_leq(bc, budget // slice_bytes), h
    return 1, _row_tile(h, budget // (w * itemsize))


# ----------------------------------------------------------------------------
# Wrapper
# ----------------------------------------------------------------------------
def resolution_scaling(x, scale_factor=2):
    """Nearest-neighbor upsample of an NCHW tensor by an integer scale factor."""
    s = int(scale_factor)
    assert x.ndim == 4 and s >= 1 and s == scale_factor
    if s == 1:
        return x

    B, C, H, W = x.shape
    BC = B * C
    itemsize = jnp.dtype(x.dtype).itemsize
    tbc, th = _pick_tiles(BC, H, W, itemsize, s)
    wc = min(128, W)  # MXU contraction chunk for the lane-replication matmul

    # 0/1 replication matrix (exact): R[w, j] = 1.0 iff j // s == w.
    r = jnp.asarray(
        (np.arange(s * wc) // s == np.arange(wc)[:, None]).astype(np.float32))

    x3 = x.reshape(BC, H, W)               # free: merges leading (row-major) dims
    grid = (BC // tbc, H // th)

    out3 = pl.pallas_call(
        partial(_nn_upsample_kernel, s=s),
        out_shape=jax.ShapeDtypeStruct((BC, H, s * s * W), x.dtype),
        grid_spec=pltpu.PrefetchScalarGridSpec(
            num_scalar_prefetch=0,
            grid=grid,
            in_specs=[
                pl.BlockSpec((tbc, th, W), lambda i, j: (i, j, 0)),
                pl.BlockSpec((wc, s * wc), lambda i, j: (0, 0)),  # resident const
            ],
            out_specs=pl.BlockSpec((tbc, th, s * s * W), lambda i, j: (i, j, 0)),
        ),
        compiler_params=pltpu.CompilerParams(
            dimension_semantics=("parallel", "parallel"),
            vmem_limit_bytes=32 * 1024 * 1024,
        ),
        cost_estimate=pl.CostEstimate(
            flops=2 * BC * H * W * s * wc,      # replication matmuls
            transcendentals=0,
            bytes_accessed=BC * H * W * itemsize * (1 + s * s),
        ),
    )(x3, r)

    # Free reshape: (BC, H, s*s*W) and (B, C, s*H, s*W) share the same flat layout.
    return out3.reshape(B, C, s * H, s * W)


class ResolutionScalingLayer:
    """Mirror of the PyTorch module: nearest-neighbor upsample by scale_factor."""

    def __init__(self, scale_factor=2):
        self.scale_factor = scale_factor

    def __call__(self, x):
        return resolution_scaling(x, self.scale_factor)


# ----------------------------------------------------------------------------
# Pure-JAX reference (== F.interpolate(x, scale_factor=s, mode='nearest'))
# ----------------------------------------------------------------------------
def _ref_upsample(x, s):
    return jnp.repeat(jnp.repeat(x, s, axis=2), s, axis=3)


# ----------------------------------------------------------------------------
if __name__ == "__main__":
    key = jax.random.PRNGKey(0)

    cases = [
        ((2, 4, 16, 16), 2),      # canonical small case
        ((2, 8, 128, 256), 2),    # BC-tiled grid (2, 1) + 2 lane chunks
        ((1, 1, 1024, 512), 2),   # H-tiled grid (1, 2) + 4 lane chunks
        ((2, 4, 16, 16), 3),      # non-default integer scale factor
    ]

    for shape, s in cases:
        key, k = jax.random.split(key)
        x = jax.random.normal(k, shape, jnp.float32)
        layer = ResolutionScalingLayer(scale_factor=s)
        y = jax.block_until_ready(layer(x))
        assert y.shape == (shape[0], shape[1], s * shape[2], s * shape[3]), y.shape
        ref = _ref_upsample(x, s)
        np.testing.assert_array_equal(np.asarray(y), np.asarray(ref))

    print("KERNEL_OK")
</pallas_src>

<mosaic_0001>
module attributes {stable_mosaic.version = 11 : i64} {
  func.func @_nn_upsample_kernel(%arg0: i32, %arg1: i32, %arg2: memref<8x16x16xf32, #tpu.memory_space<vmem>>, %arg3: memref<16x32xf32, #tpu.memory_space<vmem>>, %arg4: memref<8x16x64xf32, #tpu.memory_space<vmem>>) attributes {dimension_semantics = [#tpu.dimension_semantics<parallel>, #tpu.dimension_semantics<parallel>], iteration_bounds = array<i64: 1, 1>, scalar_prefetch = 0 : i64, scratch_operands = 0 : i64, tpu.core_type = #tpu.core_type<tc>, window_params = [{transform_indices = @transform_0, window_bounds = array<i64: 8, 16, 16>}, {pipeline_mode = #tpu.pipeline_mode<synchronous>, transform_indices = @transform_1, window_bounds = array<i64: 16, 32>}, {transform_indices = @transform_2, window_bounds = array<i64: 8, 16, 64>}]} {
    %c0 = arith.constant 0 : index
    %c0_0 = arith.constant 0 : index
    %c0_1 = arith.constant 0 : index
    %0 = vector.load %arg2[%c0, %c0_0, %c0_1] : memref<8x16x16xf32, #tpu.memory_space<vmem>>, vector<8x16x16xf32>
    %1 = vector.shape_cast %0 : vector<8x16x16xf32> to vector<128x16xf32>
    %c0_2 = arith.constant 0 : index
    %c0_3 = arith.constant 0 : index
    %2 = vector.load %arg3[%c0_2, %c0_3] : memref<16x32xf32, #tpu.memory_space<vmem>>, vector<16x32xf32>
    %cst = arith.constant dense<0.000000e+00> : vector<128x32xf32>
    %3 = tpu.matmul %1, %2, %cst {dimension_numbers = #tpu.dot_dimension_numbers<[1], [0], [0], [1], [0, 0, 1, 1], [], []>} : vector<128x16xf32>, vector<16x32xf32>, vector<128x32xf32> -> vector<128x32xf32>
    %4 = vector.shape_cast %3 : vector<128x32xf32> to vector<8x16x32xf32>
    %c0_4 = arith.constant 0 : index
    %c0_5 = arith.constant 0 : index
    %c0_6 = arith.constant 0 : index
    %5 = vector.load %arg4[%c0_4, %c0_5, %c0_6] : memref<8x16x64xf32, #tpu.memory_space<vmem>>, vector<8x16x32xf32>
    tpu.vector_store %arg4[%c0_4, %c0_5, %c0_6], %4 {strides = array<i32>} : memref<8x16x64xf32, #tpu.memory_space<vmem>>, vector<8x16x32xf32>,
    %c0_7 = arith.constant 0 : index
    %c0_8 = arith.constant 0 : index
    %c32 = arith.constant 32 : index
    %6 = vector.load %arg4[%c0_7, %c0_8, %c32] : memref<8x16x64xf32, #tpu.memory_space<vmem>>, vector<8x16x32xf32>
    tpu.vector_store %arg4[%c0_7, %c0_8, %c32], %4 {strides = array<i32>} : memref<8x16x64xf32, #tpu.memory_space<vmem>>, vector<8x16x32xf32>,
    return
  }
  func.func @transform_0(%arg0: i32, %arg1: i32) -> (i32, i32, i32) {
    %c0_i32 = arith.constant 0 : i32
    %c0_i32_0 = arith.constant 0 : i32
    return %arg0, %arg1, %c0_i32 : i32, i32, i32
  }
  func.func @transform_1(%arg0: i32, %arg1: i32) -> (i32, i32) {
    %c0_i32 = arith.constant 0 : i32
    %c0_i32_0 = arith.constant 0 : i32
    %c0_i32_1 = arith.constant 0 : i32
    return %c0_i32, %c0_i32_0 : i32, i32
  }
  func.func @transform_2(%arg0: i32, %arg1: i32) -> (i32, i32, i32) {
    %c0_i32 = arith.constant 0 : i32
    %c0_i32_0 = arith.constant 0 : i32
    return %arg0, %arg1, %c0_i32 : i32, i32, i32
  }
}

</mosaic_0001>

<bundles_post_ra>
// kernel: tpu_custom_call.1
= control target key start
LH: loop header
LB: loop body
LE: loop exit
PB: predicated region body
PF: predicated region fallthrough
CT: control target
= control target key end

     0   :  { %7 = vsyncpa [#allocation3], 0  ;;  %s644_s0 = inlined_call_operand.hbm [shape: f32[8,16,16], index: 0, kind: input, shape index: {}]   ;;  %s645_s1 = inlined_call_operand.hbm [shape: f32[16,32], index: 1, kind: input, shape index: {}]   ;;  %s646_s2 = inlined_call_operand.hbm [shape: f32[8,16,64], index: 2, kind: output, shape index: {}]  }
   0x1   :  { %8 = vsyncpa [#allocation6], 0 }
   0x2   :  { %9 = vsyncpa [#allocation4], 0  ;;  %s514_s9 = smov [#allocation2]   ;;  %s442_s13 = scalar_lea.hbm %s644_s0, 2048 }
   0x3   :  { %s15_s10 = sshll.u32 %s514_s9, 4  ;;  %p443_p0 = scmp.ne.s32.totalorder %s644_s0, %s442_s13  ;;  %s16_s10 = int_to_ptr.vmem [resolvable:$true] %s15_s10 }
   0x4   :  { %p446_p1 = scmp.lt.u32.totalorder %s442_s13, %s644_s0 }
   0x6   :  { %p448_p2 = pnand %p446_p1, %p443_p0 }
   0x8   :  { %451 = shalt.err (!%p448_p2)
}
   0x9   :  { %s452_s18 = scalar_lea.vmem %s16_s10, 2048  ;;  %p457_p4 = scmp.lt.s32.totalorder %s16_s10, %s16_s10 }
   0xa   :  { %p453_p3 = scmp.ne.s32.totalorder %s16_s10, %s452_s18  ;;  %p458_p5 = scmp.lt.s32.totalorder %s452_s18, %s452_s18 }
   0xc   :  { %p459_p6 = por %p458_p5, %p457_p4 }
   0xe   :  { %p460_p7 = pnand %p459_p6, %p453_p3 }
  0x10   :  { %463 = shalt.err (!%p460_p7)
}
  0x11   :  { %s515_s19 = smov 128   ;;  %s516_s20 = smov 8  }
  0x12   :  { %21 = dma.hbm_to_vmem [thread:$0]  %s644_s0, 2048, %s16_s10, [#allocation3], %s515_s19, %s515_s19, %s516_s20  }
  0x13   :  { %s517_s23 = smov [#allocation5]   ;;  %s464_s27 = scalar_lea.hbm %s645_s1, 256 }
  0x14   :  { %s27_s24 = sshll.u32 %s517_s23, 4  ;;  %p465_p8 = scmp.ne.s32.totalorder %s645_s1, %s464_s27  ;;  %s28_s24 = int_to_ptr.vmem [resolvable:$true] %s27_s24 }
  0x15   :  { %p468_p9 = scmp.lt.u32.totalorder %s464_s27, %s645_s1 }
  0x17   :  { %p470_p10 = pnand %p468_p9, %p465_p8 }
  0x19   :  { %473 = shalt.err (!%p470_p10)
}
  0x1a   :  { %s474_s4 = scalar_lea.vmem %s28_s24, 256  ;;  %p479_p12 = scmp.lt.s32.totalorder %s28_s24, %s28_s24 }
  0x1b   :  { %p475_p11 = scmp.ne.s32.totalorder %s28_s24, %s474_s4  ;;  %p480_p13 = scmp.lt.s32.totalorder %s474_s4, %s474_s4 }
  0x1d   :  { %p481_p0 = por %p480_p13, %p479_p12 }
  0x1f   :  { %p482_p1 = pnand %p481_p0, %p475_p11 }
  0x21   :  { %485 = shalt.err (!%p482_p1)
}
  0x22   :  { %33 = dma.hbm_to_vmem [thread:$0]  %s645_s1, 256, %s28_s24, [#allocation6], %s515_s19, %s515_s19, %s516_s20  }
  0x23   :  { %508 = dma.done.wait [#allocation3], 2048  }
  0x24   :  { %509 = vsyncadd [#allocation3], 4294965248 }
  0x25   :  { %510 = dma.done.wait [#allocation6], 256  }
  0x26   :  { %511 = vsyncadd [#allocation6], 4294967040  ;;  %vm58_vm0 = vcmask 130048   ;;  %v56_v0 = vld [vmem:[#allocation5] sm:$0xff]  ;;  %v57_v1 = vld [vmem:[#allocation5 + $0x8] sm:$0xff]  ;;  %vm252_vm1 = vcmask 261120  }
  0x27   :  { %v40_v2 = vld [vmem:[#allocation2] sm:$0xff]  ;;  %v430_v3 = vpack.c.bf16 %v57_v1, %v56_v0  ;;  %v41_v5 = vld [vmem:[#allocation2 + $0x8] sm:$0xff]  ;;  %v42_v7 = vld [vmem:[#allocation2 + $0x10] sm:$0xff]  ;;  %s518_s1 = smov 32   ;;  %vm333_vm2 = vcmask 523520   ;;  %s519_s6 = smov [#allocation7]  }
  0x28   :  { %406 = vmatprep.mubr.msk.f32.mxu0 %vm58_vm0, %v40_v2  ;;  %v48_v4 = vld [vmem:[#allocation2 + $0x40] sm:$0xff]  ;;  %v49_v6 = vld [vmem:[#allocation2 + $0x48] sm:$0xff]  ;;  %v50_v8 = vld [vmem:[#allocation2 + $0x50] sm:$0xff]  ;;  %s355_s7 = sshll.u32 %s519_s6, 4  ;;  %s356_s7 = int_to_ptr.vmem [resolvable:$true] %s355_s7 }
  0x29   :  { %418 = vmatprep.mubr.msk.f32.mxu1 %vm58_vm0, %v48_v4  ;;  %431 = vmatprep.subr.bf16.mxu0 %v430_v3  ;;  %v43_v9 = vld [vmem:[#allocation2 + $0x18] sm:$0xff]  ;;  %v44_v11 = vld [vmem:[#allocation2 + $0x20] sm:$0xff]  ;;  %v45_v13 = vld [vmem:[#allocation2 + $0x28] sm:$0xff]  ;;  %s486_s8 = scalar_lea.vmem %s356_s7, 2048  ;;  %p491_p3 = scmp.lt.s32.totalorder %s356_s7, %s356_s7 }
  0x2a   :  { %434 = vmatprep.subr.bf16.mxu1 %v430_v3  ;;  %433 = vmatpush3.bf16.msra.mxu0 %v430_v3  ;;  %v51_v10 = vld [vmem:[#allocation2 + $0x58] sm:$0xff]  ;;  %v52_v12 = vld [vmem:[#allocation2 + $0x60] sm:$0xff]  ;;  %v53_v14 = vld [vmem:[#allocation2 + $0x68] sm:$0xff]  ;;  %p487_p2 = scmp.ne.s32.totalorder %s356_s7, %s486_s8  ;;  %p492_p4 = scmp.lt.s32.totalorder %s486_s8, %s486_s8 }
  0x2b   :  { %435 = vmatpush3.bf16.msra.mxu1 %v430_v3  ;;  %v46_v15 = vld [vmem:[#allocation2 + $0x30] sm:$0xff]  ;;  %v47_v17 = vld [vmem:[#allocation2 + $0x38] sm:$0xff] }
  0x2c   :  { %v54_v16 = vld [vmem:[#allocation2 + $0x70] sm:$0xff]  ;;  %v55_v18 = vld [vmem:[#allocation2 + $0x78] sm:$0xff]  ;;  %p493_p5 = por %p492_p4, %p491_p3 }
  0x2d   :  { %407 = vmatmul.mubr.msk.f32.vlgmr.msra.gmra.mrb[0].mxu0 %vm58_vm0, %v41_v5 }
  0x2e   :  { %419 = vmatmul.mubr.msk.f32.vlgmr.msra.gmra.mrb[0].mxu1 %vm58_vm0, %v49_v6  ;;  %409 = vmatprep.mubr.msk.f32.mxu0 %vm58_vm0, %v42_v7  ;;  %p494_p6 = pnand %p493_p5, %p487_p2 }
  0x2f   :  { %421 = vmatprep.mubr.msk.f32.mxu1 %vm58_vm0, %v50_v8 }
  0x31   :  { %410 = vmatmul.mubr.msk.f32.gmra.mrb[2].mxu0 %vm58_vm0, %v43_v9 }
  0x32   :  { %422 = vmatmul.mubr.msk.f32.gmra.mrb[2].mxu1 %vm58_vm0, %v51_v10  ;;  %412 = vmatprep.mubr.msk.f32.mxu0 %vm58_vm0, %v44_v11 }
  0x33   :  { %424 = vmatprep.mubr.msk.f32.mxu1 %vm58_vm0, %v52_v12 }
  0x35   :  { %413 = vmatmul.mubr.msk.f32.gmra.mrb[4].mxu0 %vm58_vm0, %v45_v13 }
  0x36   :  { %425 = vmatmul.mubr.msk.f32.gmra.mrb[4].mxu1 %vm58_vm0, %v53_v14  ;;  %415 = vmatprep.mubr.msk.f32.mxu0 %vm58_vm0, %v46_v15 }
  0x37   :  { %427 = vmatprep.mubr.msk.f32.mxu1 %vm58_vm0, %v54_v16 }
  0x39   :  { %416 = vmatmul.mubr.msk.f32.gmra.mrb[6].mxu0 %vm58_vm0, %v47_v17 }
  0x3a   :  { %428 = vmatmul.mubr.msk.f32.gmra.mrb[6].mxu1 %vm58_vm0, %v55_v18 }
 0x100   :  { %v408_v19 = vpop.f32.mrb[0].mxu0 }
 0x101   :  { %v420_v20 = vpop.f32.mrb[0].mxu1  ;;  %254 = vst.msk [vmem:[#allocation7 + $0x8] sm:$0xff] %vm252_vm1, %v408_v19  ;;  %287 = vrot.lane.b32.xlu0 %v408_v19, %s518_s1  ;;  %v173_v22 = vpop.f32.mrb[1].mxu0 }
 0x102   :  { %262 = vst.msk [vmem:[#allocation7 + $0x48] sm:$0xff] %vm252_vm1, %v420_v20  ;;  %303 = vrot.lane.b32.xlu1 %v420_v20, %s518_s1  ;;  %v213_v21 = vpop.f32.mrb[1].mxu1  ;;  %253 = vst.msk [vmem:[#allocation7] sm:$0xff] %vm252_vm1, %v173_v22 }
 0x103   :  { %261 = vst.msk [vmem:[#allocation7 + $0x40] sm:$0xff] %vm252_vm1, %v213_v21 }
 0x104   :  { %v411_v23 = vpop.f32.mrb[2].mxu0 }
 0x105   :  { %v423_v24 = vpop.f32.mrb[2].mxu1  ;;  %256 = vst.msk [vmem:[#allocation7 + $0x18] sm:$0xff] %vm252_vm1, %v411_v23  ;;  %285 = vrot.lane.b32.xlu0 %v173_v22, %s518_s1  ;;  %v183_v25 = vpop.f32.mrb[3].mxu0 }
 0x106   :  { %291 = vrot.lane.b32.xlu1 %v411_v23, %s518_s1  ;;  %264 = vst.msk [vmem:[#allocation7 + $0x58] sm:$0xff] %vm252_vm1, %v423_v24  ;;  %v223_v26 = vpop.f32.mrb[3].mxu1  ;;  %255 = vst.msk [vmem:[#allocation7 + $0x10] sm:$0xff] %vm252_vm1, %v183_v25 }
 0x107   :  { %263 = vst.msk [vmem:[#allocation7 + $0x50] sm:$0xff] %vm252_vm1, %v223_v26 }
 0x108   :  { %v414_v27 = vpop.f32.mrb[4].mxu0 }
 0x109   :  { %v426_v28 = vpop.f32.mrb[4].mxu1  ;;  %301 = vrot.lane.b32.xlu0 %v213_v21, %s518_s1  ;;  %258 = vst.msk [vmem:[#allocation7 + $0x28] sm:$0xff] %vm252_vm1, %v414_v27  ;;  %v193_v29 = vpop.f32.mrb[5].mxu0 }
 0x10a   :  { %307 = vrot.lane.b32.xlu1 %v423_v24, %s518_s1  ;;  %266 = vst.msk [vmem:[#allocation7 + $0x68] sm:$0xff] %vm252_vm1, %v426_v28  ;;  %v233_v30 = vpop.f32.mrb[5].mxu1  ;;  %257 = vst.msk [vmem:[#allocation7 + $0x20] sm:$0xff] %vm252_vm1, %v193_v29 }
 0x10b   :  { %265 = vst.msk [vmem:[#allocation7 + $0x60] sm:$0xff] %vm252_vm1, %v233_v30 }
 0x10c   :  { %v417_v31 = vpop.f32.mrb[6].mxu0 }
 0x10d   :  { %v429_v32 = vpop.f32.mrb[6].mxu1  ;;  %305 = vrot.lane.b32.xlu0 %v223_v26, %s518_s1  ;;  %260 = vst.msk [vmem:[#allocation7 + $0x38] sm:$0xff] %vm252_vm1, %v417_v31  ;;  %v203_v33 = vpop.f32.mrb[7].mxu0 }
 0x10e   :  { %289 = vrot.lane.b32.xlu1 %v183_v25, %s518_s1  ;;  %268 = vst.msk [vmem:[#allocation7 + $0x78] sm:$0xff] %vm252_vm1, %v429_v32  ;;  %v243_v34 = vpop.f32.mrb[7].mxu1  ;;  %259 = vst.msk [vmem:[#allocation7 + $0x30] sm:$0xff] %vm252_vm1, %v203_v33 }
 0x10f   :  { %267 = vst.msk [vmem:[#allocation7 + $0x70] sm:$0xff] %vm252_vm1, %v243_v34 }
 0x111   :  { %293 = vrot.lane.b32.xlu0 %v193_v29, %s518_s1 }
 0x112   :  { %295 = vrot.lane.b32.xlu1 %v414_v27, %s518_s1 }
 0x115   :  { %309 = vrot.lane.b32.xlu0 %v233_v30, %s518_s1 }
 0x116   :  { %311 = vrot.lane.b32.xlu1 %v426_v28, %s518_s1 }
 0x119   :  { %297 = vrot.lane.b32.xlu0 %v203_v33, %s518_s1 }
 0x11a   :  { %299 = vrot.lane.b32.xlu1 %v417_v31, %s518_s1 }
 0x11d   :  { %313 = vrot.lane.b32.xlu0 %v243_v34, %s518_s1 }
 0x11e   :  { %315 = vrot.lane.b32.xlu1 %v429_v32, %s518_s1 }
 0x173   :  { %v288_v36 = vpop.permute.xlu0 %287 }
 0x174   :  { %v304_v35 = vpop.permute.xlu1 %303  ;;  %335 = vst.msk [vmem:[#allocation7 + $0x8] sm:$0xff] %vm333_vm2, %v288_v36 }
 0x175   :  { %343 = vst.msk [vmem:[#allocation7 + $0x48] sm:$0xff] %vm333_vm2, %v304_v35 }
 0x177   :  { %v286_v37 = vpop.permute.xlu0 %285 }
 0x178   :  { %v292_v38 = vpop.permute.xlu1 %291  ;;  %334 = vst.msk [vmem:[#allocation7] sm:$0xff] %vm333_vm2, %v286_v37 }
 0x179   :  { %337 = vst.msk [vmem:[#allocation7 + $0x18] sm:$0xff] %vm333_vm2, %v292_v38 }
 0x17b   :  { %v302_v39 = vpop.permute.xlu0 %301 }
 0x17c   :  { %v308_v40 = vpop.permute.xlu1 %307  ;;  %342 = vst.msk [vmem:[#allocation7 + $0x40] sm:$0xff] %vm333_vm2, %v302_v39 }
 0x17d   :  { %345 = vst.msk [vmem:[#allocation7 + $0x58] sm:$0xff] %vm333_vm2, %v308_v40 }
 0x17f   :  { %v306_v41 = vpop.permute.xlu0 %305 }
 0x180   :  { %v290_v42 = vpop.permute.xlu1 %289  ;;  %344 = vst.msk [vmem:[#allocation7 + $0x50] sm:$0xff] %vm333_vm2, %v306_v41 }
 0x181   :  { %336 = vst.msk [vmem:[#allocation7 + $0x10] sm:$0xff] %vm333_vm2, %v290_v42 }
 0x183   :  { %v294_v44 = vpop.permute.xlu0 %293 }
 0x184   :  { %v296_v43 = vpop.permute.xlu1 %295  ;;  %338 = vst.msk [vmem:[#allocation7 + $0x20] sm:$0xff] %vm333_vm2, %v294_v44 }
 0x185   :  { %339 = vst.msk [vmem:[#allocation7 + $0x28] sm:$0xff] %vm333_vm2, %v296_v43 }
 0x187   :  { %v310_v46 = vpop.permute.xlu0 %309 }
 0x188   :  { %v312_v45 = vpop.permute.xlu1 %311  ;;  %346 = vst.msk [vmem:[#allocation7 + $0x60] sm:$0xff] %vm333_vm2, %v310_v46 }
 0x189   :  { %347 = vst.msk [vmem:[#allocation7 + $0x68] sm:$0xff] %vm333_vm2, %v312_v45 }
 0x18b   :  { %v298_v48 = vpop.permute.xlu0 %297 }
 0x18c   :  { %v300_v47 = vpop.permute.xlu1 %299  ;;  %340 = vst.msk [vmem:[#allocation7 + $0x30] sm:$0xff] %vm333_vm2, %v298_v48 }
 0x18d   :  { %341 = vst.msk [vmem:[#allocation7 + $0x38] sm:$0xff] %vm333_vm2, %v300_v47 }
 0x18f   :  { %v314_v50 = vpop.permute.xlu0 %313 }
 0x190   :  { %v316_v49 = vpop.permute.xlu1 %315  ;;  %348 = vst.msk [vmem:[#allocation7 + $0x70] sm:$0xff] %vm333_vm2, %v314_v50 }
 0x191   :  { %349 = vst.msk [vmem:[#allocation7 + $0x78] sm:$0xff] %vm333_vm2, %v316_v49 }
 0x192   :  { %497 = shalt.err (!%p494_p6)
}
 0x193   :  { %s498_s11 = scalar_lea.hbm %s646_s2, 2048 }
 0x194   :  { %p499_p7 = scmp.ne.s32.totalorder %s646_s2, %s498_s11  ;;  %p502_p8 = scmp.lt.u32.totalorder %s498_s11, %s646_s2 }
 0x196   :  { %p504_p9 = pnand %p502_p8, %p499_p7 }
 0x198   :  { %507 = shalt.err (!%p504_p9)
}
 0x199   :  { %361 = dma.vmem_to_hbm [thread:$0]  %s356_s7, 2048, %s646_s2, [#allocation4], %s515_s19, %s515_s19, %s516_s20  }
 0x19a   :  { %512 = dma.done.wait [#allocation4], 2048  }
 0x19b   :  { %513 = vsyncadd [#allocation4], 4294965248 }
 0x19c   :  { %365 = vsyncpa [#allocation3], 1 }
 0x19d   :  { %366 = vsyncpa [#allocation6], 1 }
 0x19e   :  { %367 = vsyncpa [#allocation4], 1 }

</bundles_post_ra>
